<compile_context>
chip_gen: v7x
topology: tpu7x:2x2x1
jax: 0.10.0
libtpu: 0.0.40
codegen_flags: <defaults>
</compile_context>

<pallas_src>
import functools

import numpy as np
import jax
import jax.numpy as jnp
from jax import lax
from jax.experimental import pallas as pl
from jax.experimental.pallas import tpu as pltpu


def _huber_qloss_kernel(preds_ref, tgt_ref, alpha_ref, beta_ref, expand_ref,
                        out_ref, *, delta, n_inner, block_rows, valid_rows,
                        last_valid_tile, needs_branch):
    c = pl.program_id(0)          # TensorCore split ("parallel")
    j = pl.program_id(1)          # row-tile loop ("arbitrary")
    t = c * n_inner + j           # logical row-tile index

    @pl.when(j == 0)
    def _init():
        out_ref[...] = jnp.zeros_like(out_ref)

    # Loads; cast to f32 per tile (kept fused with the elementwise chain).
    preds = preds_ref[...].astype(jnp.float32)             # (TR, 128)
    t_small = tgt_ref[...].astype(jnp.float32)              # (TR, 128//Qpad)
    # Expand each target value across its Q consecutive lanes with a 0/1
    # matrix on the (otherwise idle) MXU.
    tgt = jnp.dot(t_small, expand_ref[...],
                  precision=lax.Precision.HIGHEST,
                  preferred_element_type=jnp.float32)       # (TR, 128)

    # error = y_hat - y  (PyTorch: target - preds).  Fused hinge split:
    #   error < 0 -> alpha * huber(|e|);  error > 0 -> (1-alpha) * huber(|e|);
    #   error == 0 contributes 0 either way (huber(0) == 0).
    e = tgt - preds
    ae = jnp.abs(e)
    m = jnp.minimum(ae, delta)
    h2 = m * (ae + ae - m)                                   # == 2*huber(|e|)
    w = jnp.where(e < 0.0, alpha_ref[...], beta_ref[...])    # (1,128) bcast
    contrib = w * h2                                         # (TR, 128)

    def _accumulate(x):
        # 128 parallel per-lane f32 accumulators (better numerics than a
        # single serial scalar).
        out_ref[...] += jnp.sum(x, axis=0, keepdims=True)[None]

    if needs_branch:
        @pl.when(t < last_valid_tile)
        def _full_tile():
            _accumulate(contrib)

        @pl.when(t == last_valid_tile)
        def _tail_tile():
            row = (lax.broadcasted_iota(jnp.int32, contrib.shape, 0)
                   + t * block_rows)
            _accumulate(jnp.where(row < valid_rows, contrib, 0.0))
        # Tiles with t > last_valid_tile (phantom tiles of the 2-core split /
        # grid padding) contribute nothing.
    else:
        _accumulate(contrib)


def huber_qloss(preds, target, quantiles, delta=1.0, block_rows=4096):
    """Huberized quantile loss.  preds: (B, Q); target: (B,) or (B, 1)."""
    assert preds.ndim == 2
    B, Q = preds.shape
    assert len(quantiles) == Q
    target = jnp.reshape(target, (-1,))
    assert target.shape[0] == B

    # Pad the quantile axis up to a power of two dividing 128 so every
    # 128-lane row holds an integer number of samples.
    q_pad = 1
    while q_pad < Q:
        q_pad *= 2
    assert q_pad <= 128, "at most 128 quantiles supported"
    spr = 128 // q_pad                        # samples per 128-lane row

    # Tiny resident constants: per-lane alpha / (1-alpha) (0 on dummy lanes)
    # and the 0/1 lane-expansion matrix for the target.
    a_np = np.zeros((1, 128), np.float32)
    b_np = np.zeros((1, 128), np.float32)
    e_np = np.zeros((spr, 128), np.float32)
    for lane in range(128):
        qi = lane % q_pad
        if qi < Q:
            a_np[0, lane] = float(quantiles[qi])
            b_np[0, lane] = 1.0 - float(quantiles[qi])
        e_np[lane // q_pad, lane] = 1.0
    alpha_lane = jnp.asarray(a_np)
    beta_lane = jnp.asarray(b_np)
    expand = jnp.asarray(e_np)

    # Pad batch / quantile dims only when actually required; the common
    # aligned case is a pure metadata reshape with zero extra HBM traffic.
    b_pad = ((B + spr - 1) // spr) * spr
    if b_pad != B or q_pad != Q:
        preds = jnp.pad(preds, ((0, b_pad - B), (0, q_pad - Q)))
        target = jnp.pad(target, (0, b_pad - B))
    rows = (b_pad * q_pad) // 128
    preds2d = preds.reshape(rows, 128)        # contiguous row-major: free
    target2d = target.reshape(rows, spr)

    tr = min(block_rows, rows)
    if tr < rows:
        tr = max(8, (tr // 8) * 8)            # tiled blocks: multiple of 8
    n_tiles = -(-rows // tr)
    n_inner = -(-n_tiles // 2)                # row tiles per TensorCore
    needs_branch = (2 * n_inner * tr != rows)

    kernel = functools.partial(
        _huber_qloss_kernel, delta=float(delta), n_inner=n_inner,
        block_rows=tr, valid_rows=rows, last_valid_tile=n_tiles - 1,
        needs_branch=needs_branch)

    def row_map(c, j):
        return (jnp.minimum(c * n_inner + j, n_tiles - 1), 0)

    def const_map(c, j):
        return (0, 0)

    out = pl.pallas_call(
        kernel,
        out_shape=jax.ShapeDtypeStruct((2, 1, 128), jnp.float32),
        grid_spec=pltpu.PrefetchScalarGridSpec(
            num_scalar_prefetch=0,
            grid=(2, n_inner),
            in_specs=[
                pl.BlockSpec((tr, 128), row_map),      # preds rows
                pl.BlockSpec((tr, spr), row_map),      # target rows
                pl.BlockSpec((1, 128), const_map),     # alpha per lane
                pl.BlockSpec((1, 128), const_map),     # 1 - alpha per lane
                pl.BlockSpec((spr, 128), const_map),   # 0/1 expansion matrix
            ],
            out_specs=pl.BlockSpec((1, 1, 128), lambda c, j: (c, 0, 0)),
        ),
        compiler_params=pltpu.CompilerParams(
            dimension_semantics=("parallel", "arbitrary"),
            vmem_limit_bytes=48 * 1024 * 1024),
    )(preds2d, target2d, alpha_lane, beta_lane, expand)

    # Final cross-lane/core reduce; 0.5 from the branch-free Huber form and
    # the mean over (original) batch and quantiles.
    return jnp.sum(out) * (0.5 / (B * Q))


def huber_qloss_ref(preds, target, quantiles, delta=1.0):
    """Pure-JAX mirror of the PyTorch module (sanity reference)."""
    target = target.reshape(-1).astype(jnp.float32)
    preds = preds.astype(jnp.float32)

    def huber_mean(x):
        ax = jnp.abs(x)
        return jnp.mean(jnp.where(ax <= delta, 0.5 * x * x,
                                  delta * (ax - 0.5 * delta)))

    losses = []
    for idx, alpha in enumerate(quantiles):
        error = target - preds[:, idx]
        sq = jnp.maximum(-error, 0.0)
        s1q = jnp.maximum(error, 0.0)
        losses.append(alpha * huber_mean(sq) + (1.0 - alpha) * huber_mean(s1q))
    return jnp.mean(jnp.stack(losses))


if __name__ == "__main__":
    key = jax.random.PRNGKey(0)
    k1, k2, k3, k4, k5, k6 = jax.random.split(key, 6)

    # Case 1: aligned batch (no wrapper padding), single row tile per core.
    quants1 = [0.1, 0.25, 0.5, 0.75]
    preds1 = jax.random.normal(k1, (256, 4), jnp.float32) * 2.0
    target1 = jax.random.normal(k2, (256, 1), jnp.float32)
    out1 = jax.block_until_ready(huber_qloss(preds1, target1, quants1))
    ref1 = huber_qloss_ref(preds1, target1, quants1)
    assert jnp.allclose(out1, ref1, rtol=2e-4, atol=1e-5), (out1, ref1)

    # Case 2: Q=3 (padded to 4 lanes) and unaligned batch (padded samples).
    quants2 = [0.1, 0.5, 0.9]
    preds2 = jax.random.normal(k3, (50, 3), jnp.float32) * 2.0
    target2 = jax.random.normal(k4, (50,), jnp.float32)
    out2 = jax.block_until_ready(
        huber_qloss(preds2, target2, quants2, delta=0.7))
    ref2 = huber_qloss_ref(preds2, target2, quants2, delta=0.7)
    assert jnp.allclose(out2, ref2, rtol=2e-4, atol=1e-5), (out2, ref2)

    # Case 3: multi-tile grid on both axes with a masked (partial) tail tile.
    quants3 = [0.05, 0.25, 0.6, 0.9]
    preds3 = jax.random.normal(k5, (3990, 4), jnp.float32) * 3.0
    target3 = jax.random.normal(k6, (3990, 1), jnp.float32)
    out3 = jax.block_until_ready(
        huber_qloss(preds3, target3, quants3, block_rows=32))
    ref3 = huber_qloss_ref(preds3, target3, quants3)
    assert jnp.allclose(out3, ref3, rtol=2e-4, atol=1e-5), (out3, ref3)

    print("KERNEL_OK")
</pallas_src>

<mosaic_0001>
module attributes {stable_mosaic.version = 11 : i64} {
  func.func @_huber_qloss_kernel(%arg0: i32, %arg1: i32, %arg2: memref<8x128xf32, #tpu.memory_space<vmem>>, %arg3: memref<8x32xf32, #tpu.memory_space<vmem>>, %arg4: memref<1x128xf32, #tpu.memory_space<vmem>>, %arg5: memref<1x128xf32, #tpu.memory_space<vmem>>, %arg6: memref<32x128xf32, #tpu.memory_space<vmem>>, %arg7: memref<1x1x128xf32, #tpu.memory_space<vmem>>) attributes {dimension_semantics = [#tpu.dimension_semantics<parallel>, #tpu.dimension_semantics<arbitrary>], iteration_bounds = array<i64: 2, 1>, scalar_prefetch = 0 : i64, scratch_operands = 0 : i64, tpu.core_type = #tpu.core_type<tc>, window_params = [{transform_indices = @transform_0, window_bounds = array<i64: 8, 128>}, {transform_indices = @transform_1, window_bounds = array<i64: 8, 32>}, {pipeline_mode = #tpu.pipeline_mode<synchronous>, transform_indices = @transform_2, window_bounds = array<i64: 1, 128>}, {pipeline_mode = #tpu.pipeline_mode<synchronous>, transform_indices = @transform_3, window_bounds = array<i64: 1, 128>}, {pipeline_mode = #tpu.pipeline_mode<synchronous>, transform_indices = @transform_4, window_bounds = array<i64: 32, 128>}, {transform_indices = @transform_5, window_bounds = array<i64: 1, 1, 128>}]} {
    %c1_i32 = arith.constant 1 : i32
    %0 = arith.muli %arg0, %c1_i32 : i32
    %1 = arith.addi %0, %arg1 : i32
    %c0_i32 = arith.constant 0 : i32
    %2 = arith.cmpi eq, %arg1, %c0_i32 : i32
    %3 = arith.extui %2 : i1 to i32
    %c0_i32_0 = arith.constant 0 : i32
    %4 = arith.cmpi ne, %3, %c0_i32_0 : i32
    scf.if %4 {
      %cst_16 = arith.constant 0.000000e+00 : f32
      %32 = vector.broadcast %cst_16 : f32 to vector<1x1x128xf32>
      %c0_17 = arith.constant 0 : index
      %c0_18 = arith.constant 0 : index
      %c0_19 = arith.constant 0 : index
      %33 = vector.load %arg7[%c0_17, %c0_18, %c0_19] : memref<1x1x128xf32, #tpu.memory_space<vmem>>, vector<1x1x128xf32>
      tpu.vector_store %arg7[%c0_17, %c0_18, %c0_19], %32 {strides = array<i32>} : memref<1x1x128xf32, #tpu.memory_space<vmem>>, vector<1x1x128xf32>,
    } else {
    }
    %c0 = arith.constant 0 : index
    %c0_1 = arith.constant 0 : index
    %5 = vector.load %arg2[%c0, %c0_1] : memref<8x128xf32, #tpu.memory_space<vmem>>, vector<8x128xf32>
    %c0_2 = arith.constant 0 : index
    %c0_3 = arith.constant 0 : index
    %6 = vector.load %arg3[%c0_2, %c0_3] : memref<8x32xf32, #tpu.memory_space<vmem>>, vector<8x32xf32>
    %c0_4 = arith.constant 0 : index
    %c0_5 = arith.constant 0 : index
    %7 = vector.load %arg6[%c0_4, %c0_5] : memref<32x128xf32, #tpu.memory_space<vmem>>, vector<32x128xf32>
    %cst = arith.constant dense<0.000000e+00> : vector<8x128xf32>
    %8 = tpu.matmul %6, %7, %cst {dimension_numbers = #tpu.dot_dimension_numbers<[1], [0], [0], [1], [0, 0, 1, 1], [], []>, precision = #tpu.contract_precision<fp32>} : vector<8x32xf32>, vector<32x128xf32>, vector<8x128xf32> -> vector<8x128xf32>
    %9 = arith.subf %8, %5 : vector<8x128xf32>
    %10 = math.absf %9 : vector<8x128xf32>
    %cst_6 = arith.constant 1.000000e+00 : f32
    %11 = vector.broadcast %cst_6 : f32 to vector<8x128xf32>
    %12 = arith.minimumf %10, %11 : vector<8x128xf32>
    %13 = arith.addf %10, %10 : vector<8x128xf32>
    %14 = arith.subf %13, %12 : vector<8x128xf32>
    %15 = arith.mulf %12, %14 : vector<8x128xf32>
    %cst_7 = arith.constant 0.000000e+00 : f32
    %16 = vector.broadcast %cst_7 : f32 to vector<8x128xf32>
    %17 = arith.cmpf olt, %9, %16 : vector<8x128xf32>
    %c0_8 = arith.constant 0 : index
    %c0_9 = arith.constant 0 : index
    %18 = vector.load %arg4[%c0_8, %c0_9] : memref<1x128xf32, #tpu.memory_space<vmem>>, vector<1x128xf32>
    %c0_10 = arith.constant 0 : index
    %c0_11 = arith.constant 0 : index
    %19 = vector.load %arg5[%c0_10, %c0_11] : memref<1x128xf32, #tpu.memory_space<vmem>>, vector<1x128xf32>
    %20 = vector.shape_cast %18 : vector<1x128xf32> to vector<1x128xf32>
    %21 = vector.broadcast %20 : vector<1x128xf32> to vector<8x128xf32>
    %22 = vector.shape_cast %19 : vector<1x128xf32> to vector<1x128xf32>
    %23 = vector.broadcast %22 : vector<1x128xf32> to vector<8x128xf32>
    %24 = arith.select %17, %21, %23 : vector<8x128xi1>, vector<8x128xf32>
    %25 = arith.mulf %24, %15 : vector<8x128xf32>
    %c0_i32_12 = arith.constant 0 : i32
    %26 = arith.cmpi slt, %1, %c0_i32_12 : i32
    %27 = arith.extui %26 : i1 to i32
    %c0_i32_13 = arith.constant 0 : i32
    %28 = arith.cmpi ne, %27, %c0_i32_13 : i32
    scf.if %28 {
      %c0_16 = arith.constant 0 : index
      %c0_17 = arith.constant 0 : index
      %c0_18 = arith.constant 0 : index
      %32 = vector.load %arg7[%c0_16, %c0_17, %c0_18] : memref<1x1x128xf32, #tpu.memory_space<vmem>>, vector<1x1x128xf32>
      %cst_19 = arith.constant dense<0.000000e+00> : vector<128xf32>
      %33 = vector.multi_reduction <add>, %25, %cst_19 [0] : vector<8x128xf32> to vector<128xf32>
      %34 = vector.shape_cast %33 : vector<128xf32> to vector<1x128xf32>
      %35 = vector.shape_cast %34 : vector<1x128xf32> to vector<1x1x128xf32>
      %36 = arith.addf %32, %35 : vector<1x1x128xf32>
      %c0_20 = arith.constant 0 : index
      %c0_21 = arith.constant 0 : index
      %c0_22 = arith.constant 0 : index
      %37 = vector.load %arg7[%c0_20, %c0_21, %c0_22] : memref<1x1x128xf32, #tpu.memory_space<vmem>>, vector<1x1x128xf32>
      tpu.vector_store %arg7[%c0_20, %c0_21, %c0_22], %36 {strides = array<i32>} : memref<1x1x128xf32, #tpu.memory_space<vmem>>, vector<1x1x128xf32>,
    } else {
    }
    %c0_i32_14 = arith.constant 0 : i32
    %29 = arith.cmpi eq, %1, %c0_i32_14 : i32
    %30 = arith.extui %29 : i1 to i32
    %c0_i32_15 = arith.constant 0 : i32
    %31 = arith.cmpi ne, %30, %c0_i32_15 : i32
    scf.if %31 {
      %32 = tpu.iota {dimensions = array<i32: 0>} : vector<8x128xi32>
      %c8_i32 = arith.constant 8 : i32
      %33 = arith.muli %1, %c8_i32 : i32
      %34 = vector.broadcast %33 : i32 to vector<8x128xi32>
      %35 = arith.addi %32, %34 : vector<8x128xi32>
      %c8_i32_16 = arith.constant 8 : i32
      %36 = vector.broadcast %c8_i32_16 : i32 to vector<8x128xi32>
      %37 = arith.cmpi slt, %35, %36 : vector<8x128xi32>
      %cst_17 = arith.constant 0.000000e+00 : f32
      %38 = vector.broadcast %cst_17 : f32 to vector<8x128xf32>
      %39 = arith.select %37, %25, %38 : vector<8x128xi1>, vector<8x128xf32>
      %c0_18 = arith.constant 0 : index
      %c0_19 = arith.constant 0 : index
      %c0_20 = arith.constant 0 : index
      %40 = vector.load %arg7[%c0_18, %c0_19, %c0_20] : memref<1x1x128xf32, #tpu.memory_space<vmem>>, vector<1x1x128xf32>
      %cst_21 = arith.constant dense<0.000000e+00> : vector<128xf32>
      %41 = vector.multi_reduction <add>, %39, %cst_21 [0] : vector<8x128xf32> to vector<128xf32>
      %42 = vector.shape_cast %41 : vector<128xf32> to vector<1x128xf32>
      %43 = vector.shape_cast %42 : vector<1x128xf32> to vector<1x1x128xf32>
      %44 = arith.addf %40, %43 : vector<1x1x128xf32>
      %c0_22 = arith.constant 0 : index
      %c0_23 = arith.constant 0 : index
      %c0_24 = arith.constant 0 : index
      %45 = vector.load %arg7[%c0_22, %c0_23, %c0_24] : memref<1x1x128xf32, #tpu.memory_space<vmem>>, vector<1x1x128xf32>
      tpu.vector_store %arg7[%c0_22, %c0_23, %c0_24], %44 {strides = array<i32>} : memref<1x1x128xf32, #tpu.memory_space<vmem>>, vector<1x1x128xf32>,
    } else {
    }
    return
  }
  func.func @transform_0(%arg0: i32, %arg1: i32) -> (i32, i32) {
    %c1_i32 = arith.constant 1 : i32
    %0 = arith.muli %arg0, %c1_i32 : i32
    %1 = arith.addi %0, %arg1 : i32
    %c0_i32 = arith.constant 0 : i32
    %2 = arith.minsi %1, %c0_i32 : i32
    %c0_i32_0 = arith.constant 0 : i32
    %c0_i32_1 = arith.constant 0 : i32
    return %2, %c0_i32_0 : i32, i32
  }
  func.func @transform_1(%arg0: i32, %arg1: i32) -> (i32, i32) {
    %c1_i32 = arith.constant 1 : i32
    %0 = arith.muli %arg0, %c1_i32 : i32
    %1 = arith.addi %0, %arg1 : i32
    %c0_i32 = arith.constant 0 : i32
    %2 = arith.minsi %1, %c0_i32 : i32
    %c0_i32_0 = arith.constant 0 : i32
    %c0_i32_1 = arith.constant 0 : i32
    return %2, %c0_i32_0 : i32, i32
  }
  func.func @transform_2(%arg0: i32, %arg1: i32) -> (i32, i32) {
    %c0_i32 = arith.constant 0 : i32
    %c0_i32_0 = arith.constant 0 : i32
    %c0_i32_1 = arith.constant 0 : i32
    return %c0_i32, %c0_i32_0 : i32, i32
  }
  func.func @transform_3(%arg0: i32, %arg1: i32) -> (i32, i32) {
    %c0_i32 = arith.constant 0 : i32
    %c0_i32_0 = arith.constant 0 : i32
    %c0_i32_1 = arith.constant 0 : i32
    return %c0_i32, %c0_i32_0 : i32, i32
  }
  func.func @transform_4(%arg0: i32, %arg1: i32) -> (i32, i32) {
    %c0_i32 = arith.constant 0 : i32
    %c0_i32_0 = arith.constant 0 : i32
    %c0_i32_1 = arith.constant 0 : i32
    return %c0_i32, %c0_i32_0 : i32, i32
  }
  func.func @transform_5(%arg0: i32, %arg1: i32) -> (i32, i32, i32) {
    %c0_i32 = arith.constant 0 : i32
    %c0_i32_0 = arith.constant 0 : i32
    %c0_i32_1 = arith.constant 0 : i32
    return %arg0, %c0_i32, %c0_i32_0 : i32, i32, i32
  }
}

</mosaic_0001>

<bundles_post_ra>
// kernel: tpu_custom_call.1
= control target key start
LH: loop header
LB: loop body
LE: loop exit
PB: predicated region body
PF: predicated region fallthrough
CT: control target
= control target key end

     0   :  { %s1784_s0 = inlined_call_operand.hbm [shape: f32[8,128], index: 0, kind: input, shape index: {}]   ;;  %s1785_s1 = inlined_call_operand.hbm [shape: f32[8,32], index: 1, kind: input, shape index: {}]   ;;  %s1786_s2 = inlined_call_operand.vmem [shape: f32[1,128], index: 2, kind: input, shape index: {}]   ;;  %s1787_s3 = inlined_call_operand.vmem [shape: f32[1,128], index: 3, kind: input, shape index: {}]   ;;  %s1788_s4 = inlined_call_operand.hbm [shape: f32[32,128], index: 4, kind: input, shape index: {}]   ;;  %s1789_s5 = inlined_call_operand.hbm [shape: f32[2,1,128], index: 5, kind: output, shape index: {}]  }
   0x1   :  { %1795 = sst [smem:[#allocation14_spill]] %s1788_s4 }
   0x2   :  { %10 = vsyncpa [#allocation3], 0 }
   0x3   :  { %12 = vsyncpa [#allocation3 + $0x1], 0 }
   0x4   :  { %13 = vsyncpa [#allocation6], 0 }
   0x5   :  { %15 = vsyncpa [#allocation6 + $0x1], 0 }
   0x6   :  { %16 = vsyncpa [#allocation4], 0 }
   0x7   :  { %18 = vsyncpa [#allocation4 + $0x1], 0  ;;  %s1511_s18 = smov 0   ;;  %s1513_s19 = smov 0  }
   0x8   :  { %s1515_s20 = smov 0   ;;  %s1517_s21 = smov 0  }
   0x9   :  { %s1519_s22 = smov 0   ;;  %s1521_s23 = smov 0  }
   0xa   :  { %s1523_s24 = smov 0   ;;  %s1525_s25 = smov 0  }
   0xb LB: > { %s1550_s26 = sadd.s32 4294967295, %s1470_s25   ;;  %s1003_s27 = sadd.s32 4294967294, %s1470_s25   ;;  %s1470_s25 = sphi %s1525_s25, %s24_s25   ;;  %s1466_s24 = sphi %s1523_s24, %s1817_s24   ;;  %s1462_s23 = sphi %s1521_s23, %s1816_s23   ;;  %s1458_s22 = sphi %s1519_s22, %s1774_s22   ;;  %s1454_s21 = sphi %s1517_s21, %s1815_s21   ;;  %s1450_s20 = sphi %s1515_s20, %s1814_s20   ;;  %s1446_s19 = sphi %s1513_s19, %s1813_s19   ;;  %s1442_s18 = sphi %s1511_s18, %s1812_s18  }
   0xc   : > { %p62_p0 = scmp.ne.s32.totalorder %s1458_s22, %s1454_s21  ;;  %p1790_p1 = scmp.eq.s32.totalorder %s1550_s26, 0 }
   0xd   : > { %p180_p2 = scmp.ne.s32.totalorder %s1450_s20, %s1446_s19  ;;  %p181_p3 = scmp.eq.s32.totalorder %s1550_s26, 1 }
   0xe   : > { %p1560_p4 = por %p1790_p1, %p62_p0  ;;  %p186_p5 = scmp.ne.s32.totalorder %s1446_s19, %s1442_s18 }
   0xf   : > { %p1566_p6 = por %p181_p3, %p180_p2  ;;  %p187_p7 = scmp.eq.s32.totalorder %s1003_s27, 1 }
  0x10   : > { %s1796_s28 = scalar_select %p1560_p4, 1, 0 }
  0x11   : > { %s1797_s29 = scalar_select %p1566_p6, 1, 0 }
  0x12   : > { %p1004_p8 = scmp.ge.s32.totalorder %s1470_s25, 1  ;;  %p194_p9 = scmp.lt.s32.totalorder %s1470_s25, 3 }
  0x13   : > { %p1572_p10 = por %p187_p7, %p186_p5  ;;  %s1472_s7 = smov [#allocation7]  }
  0x14   : > { %p1576_p11 = pnand %p1004_p8, %p194_p9  ;;  %s212_s8 = sshll.u32 %s1472_s7, 4  ;;  %s213_s8 = int_to_ptr.vmem [resolvable:$true] %s212_s8 }
  0x15   : > { %s1798_s30 = scalar_select %p1572_p10, 1, 0 }
  0x16   : > { %s1799_s6 = scalar_select %p1576_p11, 1, 0 }
  0x17   : > { %p1174_p12 = pneg %p1576_p11  ;;  %s1801_s4 = sld [smem:[#allocation14_spill]] }
  0x19   : > { %p1585_p0 = pnand %p1174_p12, %p1790_p1 }
  0x1b   : > { %p1273_p3 = pneg %p1585_p0 }
  0x1d   : > { %s1271_s12 = scalar_lea.hbm %s1801_s4, 512 }
  0x1e   : > { %p1272_p2 = scmp.ne.s32.totalorder %s1801_s4, %s1271_s12  ;;  %p1278_p8 = scmp.lt.u32.totalorder %s1271_s12, %s1801_s4 }
  0x20   : > { %p1274_p5 = pnand %p1273_p3, %p1272_p2 }
  0x22   : > { %p1275_p7 = pneg %p1274_p5 }
  0x24   : > { %p1280_p9 = pnand %p1278_p8, %p1275_p7 }
  0x26   : > { %1283 = shalt.err (!%p1280_p9)
}
  0x27   : > { %s1284_s17 = scalar_lea.vmem %s213_s8, 512  ;;  %p1292_p10 = scmp.lt.s32.totalorder %s213_s8, %s213_s8 }
  0x28   : > { %p1285_p12 = scmp.ne.s32.totalorder %s213_s8, %s1284_s17  ;;  %p1293_p6 = scmp.lt.s32.totalorder %s1284_s17, %s1284_s17 }
  0x2a   : > { %p1287_p13 = pnand %p1285_p12, %p1273_p3  ;;  %p1294_p4 = por %p1293_p6, %p1292_p10 }
  0x2c   : > { %p1288_p1 = pneg %p1287_p13 }
  0x2e   : > { %p1295_p11 = pnand %p1294_p4, %p1288_p1 }
  0x30   : > { %1298 = shalt.err (!%p1295_p11)
}
  0x31   : > { %s1473_s21 = smov 128   ;;  %s1474_s27 = smov 8  }
  0x32   : > { %1177 = dma.hbm_to_vmem [thread:$0]  (!%p1585_p0), %s1801_s4, 512, %s213_s8, [#allocation6], %s1473_s21, %s1473_s21, %s1474_s27  }
  0x33   : > { %s36_s11 = sadd.s32 1, %s1466_s24  ;;  %p1439_p1 = scmp.ne.s32.totalorder %s1458_s22, 0 }
  0x34   : > { %p38_p13 = scmp.ge.s32.totalorder %s36_s11, 2  ;;  %p57_p4 = scmp.eq.s32.totalorder %s1470_s25, 0 }
  0x35   : > { %s170_s13 = sadd.s32 1, %s1450_s20  ;;  %p1190_p11 = scmp.lt.s32.totalorder %s1470_s25, 2 }
  0x36   : > { %s1819_s11 = smov (%p38_p13, %s36_s11), 0  ;;  %p58_p6 = por %p1439_p1, %p57_p4 }
  0x37   : > { %1802 = sst [smem:[#allocation13_spill]] %s1819_s11  ;;  %s167_s12 = ssub.s32 %s1466_s24, %s1819_s11 }
  0x38   : > { %p168_p10 = scmp.eq.s32.totalorder %s167_s12, 0  ;;  %s1475_s15 = smov [#allocation2]  }
  0x39   : > { %s240_s9 = sshll.u32 %s1475_s15, 4  ;;  %p1617_p2 = pnand %p1190_p11, %p58_p6  ;;  %s241_s9 = int_to_ptr.vmem [resolvable:$true] %s240_s9 }
  0x3a   : > { %s1615_s14 = scalar_select %p168_p10, %s1450_s20, %s170_s13  }
  0x3b   : > { %s1299_s21 = scalar_lea.hbm %s1784_s0, 128  ;;  %p1301_p3 = pneg %p1617_p2 }
  0x3c   : > { %p1300_p0 = scmp.ne.s32.totalorder %s1784_s0, %s1299_s21  ;;  %p1306_p8 = scmp.lt.u32.totalorder %s1299_s21, %s1299_s21 }
  0x3d   : > { %p1308_p9 = scmp.lt.u32.totalorder %s1299_s21, %s1784_s0 }
  0x3e   : > { %p1302_p5 = pnand %p1301_p3, %p1300_p0 }
  0x3f   : > { %p1309_p12 = por %p1308_p9, %p1306_p8 }
  0x40   : > { %p1303_p7 = pneg %p1302_p5 }
  0x42   : > { %p1310_p13 = pnand %p1309_p12, %p1303_p7 }
  0x44   : > { %1313 = shalt.err (!%p1310_p13)
}
  0x45   : > { %s1314_s13 = scalar_lea.vmem %s241_s9, 128  ;;  %s1321_s15 = scalar_lea.vmem %s241_s9, 256 }
  0x46   : > { %p1315_p1 = scmp.ne.s32.totalorder %s241_s9, %s1314_s13  ;;  %p1322_p10 = scmp.lt.s32.totalorder %s241_s9, %s241_s9 }
  0x47   : > { %p1323_p11 = scmp.lt.s32.totalorder %s1321_s15, %s1314_s13 }
  0x48   : > { %p1317_p4 = pnand %p1315_p1, %p1301_p3 }
  0x49   : > { %p1324_p0 = por %p1323_p11, %p1322_p10 }
  0x4a   : > { %p1318_p6 = pneg %p1317_p4 }
  0x4c   : > { %p1325_p5 = pnand %p1324_p0, %p1318_p6 }
  0x4e   : > { %1328 = shalt.err (!%p1325_p5)
}
  0x4f   : > { %1181 = dma.hbm_to_vmem [thread:$0]  (!%p1617_p2), %s1784_s0, 128, %s241_s9, [#allocation3]  }
  0x50   : > { %s247_s21 = sand.u32 1, %s1470_s25   ;;  %s1476_s27 = smov [#allocation5]  }
  0x51   : > { %s261_s7 = sshll.u32 %s1476_s27, 4  ;;  %s248_s10 = scalar_lea.sflag [#allocation6], %s247_s21  ;;  %s262_s7 = int_to_ptr.vmem [resolvable:$true] %s261_s7 }
  0x52   : > { %s1329_s13 = scalar_lea.hbm %s1785_s1, 128 }
  0x53   : > { %p1330_p7 = scmp.ne.s32.totalorder %s1785_s1, %s1329_s13  ;;  %p1336_p12 = scmp.lt.u32.totalorder %s1329_s13, %s1329_s13 }
  0x54   : > { %p1338_p13 = scmp.lt.u32.totalorder %s1329_s13, %s1785_s1 }
  0x55   : > { %p1332_p8 = pnand %p1330_p7, %p1301_p3 }
  0x56   : > { %p1339_p1 = por %p1338_p13, %p1336_p12 }
  0x57   : > { %p1333_p9 = pneg %p1332_p8 }
  0x59   : > { %p1340_p4 = pnand %p1339_p1, %p1333_p9 }
  0x5b   : > { %1343 = shalt.err (!%p1340_p4)
}
  0x5c   : > { %s1344_s17 = scalar_lea.vmem %s262_s7, 128  ;;  %s1351_s4 = scalar_lea.vmem %s262_s7, 256 }
  0x5d   : > { %p1345_p6 = scmp.ne.s32.totalorder %s262_s7, %s1344_s17  ;;  %p1352_p0 = scmp.lt.s32.totalorder %s262_s7, %s262_s7 }
  0x5e   : > { %p1353_p5 = scmp.lt.s32.totalorder %s1351_s4, %s1344_s17 }
  0x5f   : > { %p1347_p10 = pnand %p1345_p6, %p1301_p3 }
  0x60   : > { %p1354_p7 = por %p1353_p5, %p1352_p0 }
  0x61   : > { %p1348_p11 = pneg %p1347_p10 }
  0x63   : > { %p1355_p8 = pnand %p1354_p7, %p1348_p11 }
  0x65   : > { %1358 = shalt.err (!%p1355_p8)
}
  0x66   : > { %1184 = dma.hbm_to_vmem [thread:$0]  (!%p1617_p2), %s1785_s1, 128, %s262_s7, %s248_s10  }
  0x67   : > { %p1804_p9 = scmp.ne.s32.totalorder %s1799_s6, 0 }
  0x68   : > { %s272_s27 = sand.u32 (!%p1804_p9), 1, %s1458_s22   ;;  %p1805_p3 = scmp.ne.s32.totalorder (!%p1804_p9), %s1796_s28, 0 }
  0x69   : > { %270 = sbr.rel (%p1804_p9) target bundleno = 440 (0x1b8), region = 40  ;;  %s1667_s12 = sshll.u32 (!%p1804_p9), %s272_s27, 3 }
  0x6a   : > { %s273_s13 = scalar_lea.sflag (!%p1804_p9), [#allocation3], %s272_s27  ;;  %s276_s15 = scalar_lea.vmem (!%p1804_p9), [#allocation2], %s1667_s12 }
  0x70   : > { %1424 = dma.done.wait (%p1805_p3), %s273_s13, 128  }
  0x71   : > { %1426 = vsyncadd (%p1805_p3), %s273_s13, 4294967168  ;;  %s281_s16 = sand.u32 1, %s1550_s26   ;;  %s285_s6 = scalar_lea.vmem [#allocation5], %s1667_s12 }
  0x72   : > { %s282_s7 = scalar_lea.sflag [#allocation6], %s281_s16 }
  0x73   : > { %1428 = dma.done.wait (%p1805_p3), %s282_s7, 128  }
  0x74   : > { %1430 = vsyncadd (%p1805_p3), %s282_s7, 4294967168  ;;  %p1806_p2 = scmp.eq.s32.totalorder %s1550_s26, 0 }
  0x76   : > { %1432 = dma.done.wait (%p1806_p2), [#allocation6], 512   ;;  %p1807_p12 = pmov %p1806_p2 }
  0x77   : > { %s318_s10 = sand.u32 1, %s1446_s19   ;;  %v1477_v0 = vmov 0.0|0.0   ;;  %v1478_v1 = vmov 0.0   ;;  %vm1479_vm0 = vmmov 0   ;;  %vm338_vm1 = vcmask 261120   ;;  %v334_v2 = vld [vmem:[#allocation7] sm:$0xff] }
  0x78   : > { %1434 = vsyncadd (%p1807_p12), [#allocation6], 4294966784  ;;  %1119 = vmatprep.subr.bf16.mxu1 %v1477_v0  ;;  %1137 = vmatprep.subr.bf16.mxu0 %v1477_v0  ;;  %s1689_s8 = scalar_lea.vmem [#allocation8], %s318_s10  ;;  %v335_v3 = vld [vmem:[#allocation7 + $0x8] sm:$0xff]  ;;  %v336_v4 = vld [vmem:[#allocation7 + $0x10] sm:$0xff]  ;;  %v343_v5 = vand.u32 4294901760, %v334_v2 }
  0x79   : > { %331 = vst [vmem:[%s1689_s8] sm:$0x1] %v1478_v1  ;;  %1061 = vmatprep.mubr.msk.f32.mxu1 %vm1479_vm0, %v1478_v1  ;;  %1094 = vmatprep.mubr.msk.f32.mxu0 %vm1479_vm0, %v1478_v1  ;;  %v346_v6 = vand.u32 4294901760, %v335_v3  ;;  %v337_v7 = vld [vmem:[#allocation7 + $0x18] sm:$0xff]  ;;  %v349_v8 = vand.u32 4294901760, %v336_v4  ;;  %v332_v44 = vld [vmem:[%s276_s15] sm:$0xff]  ;;  %p1017_p13 = scmp.ge.s32.totalorder %s1462_s23, 0 }
  0x7a   : > { %v333_v9 = vld [vmem:[%s285_s6] sm:$0xff]  ;;  %v352_v10 = vand.u32 4294901760, %v337_v7  ;;  %v423_v13 = vsub.f32 %v334_v2, %v343_v5  ;;  %v1015_v52 = vld [vmem:[%s1786_s2] ss:$0 sm:$0xff] }
  0x7b   : > { %v340_v11 = vsel %vm338_vm1, %v333_v9, 0  ;;  %v1120_v12 = vpack.c.bf16 %v346_v6, %v343_v5  ;;  %v430_v14 = vsub.f32 %v335_v3, %v346_v6  ;;  %v437_v15 = vsub.f32 %v336_v4, %v349_v8  ;;  %v1016_v53 = vld [vmem:[%s1787_s3] ss:$0 sm:$0xff] }
  0x7c   : > { %v444_v16 = vsub.f32 %v337_v7, %v352_v10  ;;  %v411_v17 = vand.u32 4294901760, %v340_v11  ;;  %v1123_v18 = vpack.c.bf16 %v352_v10, %v349_v8  ;;  %v424_v19 = vand.u32 4294901760, %v423_v13 }
  0x7d   : > { %1121 = vmatpush3.bf16.msra.mxu1 %v1120_v12  ;;  %1139 = vmatpush3.bf16.msra.mxu0 %v1120_v12  ;;  %v431_v20 = vand.u32 4294901760, %v430_v14  ;;  %v438_v21 = vand.u32 4294901760, %v437_v15  ;;  %v1132_v39 = vpack.c.bf16 %v430_v14, %v423_v13 }
  0x7e   : > { %1122 = vmatprep.subr.bf16.mxu1 %v1477_v0  ;;  %1140 = vmatprep.subr.bf16.mxu0 %v1477_v0  ;;  %v412_v22 = vsub.f32 %v340_v11, %v411_v17  ;;  %v445_v23 = vand.u32 4294901760, %v444_v16  ;;  %v425_v24 = vsub.f32 %v423_v13, %v424_v19  ;;  %v1135_v40 = vpack.c.bf16 %v444_v16, %v437_v15 }
  0x7f   : > { %v432_v25 = vsub.f32 %v430_v14, %v431_v20  ;;  %v439_v26 = vsub.f32 %v437_v15, %v438_v21  ;;  %v1144_v31 = vpack.c.bf16 %v431_v20, %v424_v19 }
  0x80   : > { %v413_v27 = vand.u32 4294901760, %v412_v22  ;;  %v446_v28 = vsub.f32 %v444_v16, %v445_v23  ;;  %v426_v29 = vand.u32 4294901760, %v425_v24  ;;  %v1147_v37 = vpack.c.bf16 %v445_v23, %v438_v21  ;;  %v854_v62 = vld [vmem:[%s1689_s8] sm:$0x1] (!%p1017_p13) }
  0x81   : > { %1124 = vmatpush3.bf16.msra.mxu1 %v1123_v18  ;;  %1142 = vmatpush3.bf16.msra.mxu0 %v1123_v18  ;;  %v433_v30 = vand.u32 4294901760, %v432_v25  ;;  %v440_v34 = vand.u32 4294901760, %v439_v26 }
  0x82   : > { %v414_v32 = vsub.f32 %v412_v22, %v413_v27  ;;  %1125 = vmatprep.subr.bf16.mxu1 %v1477_v0  ;;  %1143 = vmatprep.subr.bf16.mxu0 %v1477_v0  ;;  %v447_v35 = vand.u32 4294901760, %v446_v28 }
  0x83   : > { %v1126_v33 = vpack.c.bf16 %v433_v30, %v426_v29 }
  0x84   : > { %v415_v36 = vand.u32 4294901760, %v414_v32  ;;  %1095 = vmatmul.mubr.f32.vlgmr.msra.gmra.mrb[0].mxu0 %v413_v27  ;;  %v1129_v38 = vpack.c.bf16 %v447_v35, %v440_v34 }
  0x85   : > { %1145 = vmatpush3.bf16.msra.mxu0 %v1144_v31  ;;  %1105 = vmatprep.mubr.msk.f32.mxu0 %vm1479_vm0, %v1478_v1 }
  0x86   : > { %1062 = vmatmul.mubr.f32.vlgmr.msra.gmra.mrb[0].mxu1 %v415_v36  ;;  %1146 = vmatprep.subr.bf16.mxu0 %v1477_v0 }
  0x87   : > { %1127 = vmatpush3.bf16.msra.mxu1 %v1126_v33  ;;  %1072 = vmatprep.mubr.msk.f32.mxu1 %vm1479_vm0, %v1478_v1 }
  0x88   : > { %1128 = vmatprep.subr.bf16.mxu1 %v1477_v0 }
  0x89   : > { %1148 = vmatpush3.bf16.msra.mxu0 %v1147_v37 }
  0x8a   : > { %1149 = vmatprep.subr.bf16.mxu0 %v1477_v0 }
  0x8b   : > { %1130 = vmatpush3.bf16.msra.mxu1 %v1129_v38 }
  0x8c   : > { %1131 = vmatprep.subr.bf16.mxu1 %v1477_v0  ;;  %1106 = vmatmul.mubr.f32.vlgmr.msra.gmra.mrb[0].mxu0 %v411_v17 }
  0x8d   : > { %1151 = vmatpush3.bf16.msra.mxu0 %v1120_v12  ;;  %1116 = vmatprep.mubr.msk.f32.mxu0 %vm1479_vm0, %v1478_v1 }
  0x8e   : > { %1073 = vmatmul.mubr.f32.vlgmr.msra.gmra.mrb[0].mxu1 %v411_v17  ;;  %1152 = vmatprep.subr.bf16.mxu0 %v1477_v0 }
  0x8f   : > { %1133 = vmatpush3.bf16.msra.mxu1 %v1132_v39  ;;  %1083 = vmatprep.mubr.msk.f32.mxu1 %vm1479_vm0, %v1478_v1 }
  0x90   : > { %1134 = vmatprep.subr.bf16.mxu1 %v1477_v0 }
  0x91   : > { %1154 = vmatpush3.bf16.msra.mxu0 %v1123_v18 }
  0x93   : > { %1136 = vmatpush3.bf16.msra.mxu1 %v1135_v40 }
  0x94   : > { %1117 = vmatmul.mubr.f32.vlgmr.msra.gmra.mrb[0].mxu0 %v411_v17 }
  0x96   : > { %1084 = vmatmul.mubr.f32.vlgmr.msra.gmra.mrb[0].mxu1 %v412_v22 }
 0x167   : > { %v823_v41 = vpop.f32.mrb[0].mxu0 }
 0x168   : > { %v1118_v42 = vpop.f32.mrb[1].mxu0 }
 0x169   : > { %v588_v43 = vpop.f32.mrb[0].mxu1 }
 0x16a   : > { %v1155_v45 = vadd.f32 %v823_v41, %v588_v43  ;;  %v1085_v46 = vpop.f32.mrb[1].mxu1 }
 0x16c   : > { %v827_v47 = vsub.f32 %v1155_v45, %v332_v44 }
 0x16e   : > { %v828_v48 = vand.u32 2147483647, %v827_v47  ;;  %vm833_vm2 = vcmp.lt.f32.partialorder %v827_v47, 0.0 }
 0x16f   : > { %v848_v55 = vsel %vm833_vm2, %v1015_v52, %v1016_v53 }
 0x170   : > { %v829_v49 = vmin.f32 %v828_v48, 1.0  ;;  %v830_v50 = vadd.f32 %v828_v48, %v828_v48  ;;  %853 = sbr.rel (%p1017_p13) target bundleno = 391 (0x187), region = 60 }
 0x172   : > { %v831_v51 = vsub.f32 %v830_v50, %v829_v49 }
 0x174   : > { %v832_v54 = vmul.f32 %v831_v51, %v829_v49 }
 0x176   : > { %v849_v56 = vmul.f32 %v848_v55, %v832_v54 }
 0x178   : > { %v855_v57 = vrot.slane %v849_v56, 4 }
 0x17a   : > { %v856_v58 = vadd.f32 %v855_v57, %v849_v56 }
 0x17c   : > { %v857_v59 = vrot.slane %v856_v58, 2 }
 0x17e   : > { %v858_v60 = vadd.f32 %v857_v59, %v856_v58 }
 0x180   : > { %v859_v61 = vrot.slane %v858_v60, 1 }
 0x182   : > { %v860_v63 = vadd.f32 %v859_v61, %v858_v60 }
 0x184   : > { %v861_v0 = vadd.f32 %v860_v63, %v854_v62 }
 0x186   : > { %862 = vst [vmem:[%s1689_s8] sm:$0x1] %v861_v0 }
 0x187 PF: > { %p1018_p1 = scmp.ne.s32.totalorder %s1462_s23, 0 }
 0x188   : > { %v867_v1 = vlaneseq (!%p1018_p1)  ;;  %s1019_s4 = sshll.u32 (!%p1018_p1), %s1462_s23, 3 }
 0x189   : > { %866 = sbr.rel (%p1018_p1) target bundleno = 415 (0x19f), region = 64  ;;  %v870_v2 = vstv (!%p1018_p1), %s1019_s4 }
 0x18a   : > { %v868_v3 = vshrl.u32 (!%p1018_p1), %v867_v1, 7 }
 0x18c   : > { %v871_v4 = vadd.s32 (!%p1018_p1), %v870_v2, %v868_v3 }
 0x18d   : > { %v874_v11 = vld [vmem:[%s1689_s8] sm:$0x1] (!%p1018_p1) }
 0x18e   : > { %vm872_vm3 = vcmp.lt.s32.totalorder (!%p1018_p1), %v871_v4, 8 }
 0x18f   : > { %v873_v5 = vsel (!%p1018_p1), %vm872_vm3, %v849_v56, 0.0 }
 0x190   : > { %v875_v6 = vrot.slane %v873_v5, 4 }
 0x192   : > { %v876_v7 = vadd.f32 %v875_v6, %v873_v5 }
 0x194   : > { %v877_v8 = vrot.slane %v876_v7, 2 }
 0x196   : > { %v878_v9 = vadd.f32 %v877_v8, %v876_v7 }
 0x198   : > { %v879_v10 = vrot.slane %v878_v9, 1 }
 0x19a   : > { %v880_v12 = vadd.f32 %v879_v10, %v878_v9 }
 0x19c   : > { %v881_v13 = vadd.f32 %v880_v12, %v874_v11 }
 0x19e   : > { %882 = vst [vmem:[%s1689_s8] sm:$0x1] %v881_v13 }
 0x19f PF: > { %s1020_s11 = sshll.u32 %s1462_s23, 4  ;;  %s896_s13 = sshll.u32 %s1689_s8, 4  ;;  %s897_s13 = int_to_ptr.vmem [resolvable:$true] %s896_s13 }
 0x1a0   : > { %s1734_s12 = scalar_lea.hbm %s1789_s5, %s1020_s11  ;;  %s884_s15 = scalar_lea.sflag [#allocation4], %s318_s10 }
 0x1a1   : > { %s1359_s16 = scalar_lea.vmem %s897_s13, 16  ;;  %p1808_p6 = scmp.ne.s32.totalorder %s1797_s29, 0 }
 0x1a2   : > { %p1360_p4 = scmp.ne.s32.totalorder %s897_s13, %s1359_s16  ;;  %s1480_s7 = smov [#allocation8]  }
 0x1a3   : > { %s1363_s6 = sshll.u32 %s1480_s7, 4  ;;  %s1364_s6 = int_to_ptr.vmem [resolvable:$false] %s1363_s6 }
 0x1a4   : > { %p1361_p10 = pnand %p1360_p4, %p1808_p6  ;;  %s1365_s26 = scalar_lea.vmem %s1364_s6, 32 }
 0x1a5   : > { %p1366_p0 = scmp.lt.s32.totalorder %s897_s13, %s1364_s6  ;;  %p1367_p5 = scmp.lt.s32.totalorder %s1365_s26, %s1359_s16 }
 0x1a6   : > { %p1362_p11 = pneg %p1361_p10 }
 0x1a7   : > { %p1368_p7 = por %p1367_p5, %p1366_p0 }
 0x1a9   : > { %p1369_p8 = pnand %p1368_p7, %p1362_p11 }
 0x1ab   : > { %1372 = shalt.err (!%p1369_p8)
}
 0x1ac   : > { %s1373_s23 = scalar_lea.hbm %s1734_s12, 16  ;;  %s1377_s28 = scalar_lea.hbm %s1789_s5, 32 }
 0x1ad   : > { %p1374_p9 = scmp.ne.s32.totalorder %s1734_s12, %s1373_s23  ;;  %p1378_p12 = scmp.lt.u32.totalorder %s1734_s12, %s1789_s5 }
 0x1ae   : > { %p1379_p13 = scmp.lt.u32.totalorder %s1377_s28, %s1373_s23  ;;  %p1381_p4 = scmp.lt.u32.totalorder %s1373_s23, %s1734_s12 }
 0x1af   : > { %p1375_p3 = pnand %p1374_p9, %p1808_p6 }
 0x1b0   : > { %p1380_p1 = por %p1379_p13, %p1378_p12 }
 0x1b1   : > { %p1376_p2 = pneg %p1375_p3 }
 0x1b2   : > { %p1382_p10 = por %p1381_p4, %p1380_p1 }
 0x1b4   : > { %p1383_p11 = pnand %p1382_p10, %p1376_p2 }
 0x1b6   : > { %1386 = shalt.err (!%p1383_p11)
}
 0x1b7   : > { %1172 = dma.vmem_to_hbm [thread:$0]  (%p1808_p6), %s897_s13, 16, %s1734_s12, %s884_s15  }
 0x1b8 PF: > { %s908_s4 = sand.u32 1, %s1442_s18   ;;  %p1809_p0 = scmp.ne.s32.totalorder %s1798_s30, 0 }
 0x1b9   : > { %p1810_p5 = scmp.ge.s32.totalorder %s1470_s25, 2  ;;  %s909_s11 = scalar_lea.sflag [#allocation4], %s908_s4 }
 0x1bb   : > { %p1186_p7 = pnand %p1810_p5, %p1809_p0 }
 0x1bd   : > { %1436 = dma.done.wait (!%p1186_p7), %s909_s11, 16  }
 0x1be   : > { %1438 = vsyncadd (!%p1186_p7), %s909_s11, 4294967280  ;;  %s24_s25 = sadd.s32 1, %s1470_s25   ;;  %s1811_s29 = sld [smem:[#allocation13_spill]] }
 0x1bf   : > { %p21_p8 = scmp.ge.s32.totalorder %s24_s25, 4   ;;  %s1812_s18 = smov %s1446_s19 }
 0x1c0   : > { %s1813_s19 = smov %s1450_s20  ;;  %s1814_s20 = smov %s1615_s14 }
 0x1c1   : > { %s1815_s21 = smov %s1458_s22  ;;  %s1774_s22 = smov 0  }
 0x1c2   : > { %s1816_s23 = smov %s1466_s24  ;;  %23 = sbr.rel (!%p21_p8) target bundleno = 11 (0xb), region = 114 }
 0x1c4   : > { %s1817_s24 = smov %s1811_s29 }
 0x1c9   :  { %913 = vsyncpa [#allocation3], 1 }
 0x1ca   :  { %915 = vsyncpa [#allocation3 + $0x1], 1 }
 0x1cb   :  { %916 = vsyncpa [#allocation6], 1 }
 0x1cc   :  { %918 = vsyncpa [#allocation6 + $0x1], 1 }
 0x1cd   :  { %919 = vsyncpa [#allocation4], 1 }
 0x1ce   :  { %921 = vsyncpa [#allocation4 + $0x1], 1 }

</bundles_post_ra>
